<compile_context>
chip_gen: v5e
topology: v5e:2x2
jax: 0.10.0
libtpu: 0.0.40
codegen_flags: <defaults>
</compile_context>

<pallas_src>
import functools

import jax
import jax.numpy as jnp
from jax.experimental import pallas as pl
from jax.experimental.pallas import tpu as pltpu


def _round_up(x, m):
    return ((x + m - 1) // m) * m


def qnet_kernel(x_ref, w1_ref, b1_ref, w2_ref, b2_ref, w3_ref, b3_ref, o_ref):
    """Fused 3-layer MLP: relu(x@W1+b1) -> relu(.@W2+b2) -> .@W3+b3."""
    mm_dtype = w1_ref.dtype  # bf16 on v6e/v7x (2x MXU rate), or f32 if requested
    # fc1 + relu (f32 accumulate, f32 bias/ReLU)
    h1 = jnp.dot(x_ref[...].astype(mm_dtype), w1_ref[...],
                 preferred_element_type=jnp.float32)
    h1 = jnp.maximum(h1 + b1_ref[...], 0.0)
    # fc2 + relu
    h2 = jnp.dot(h1.astype(mm_dtype), w2_ref[...],
                 preferred_element_type=jnp.float32)
    h2 = jnp.maximum(h2 + b2_ref[...], 0.0)
    # fc3 (no activation); output columns are lane-padded to 128
    out = jnp.dot(h2.astype(mm_dtype), w3_ref[...],
                  preferred_element_type=jnp.float32) + b3_ref[...]
    o_ref[...] = out.astype(o_ref.dtype)


@functools.partial(jax.jit, static_argnames=("tile_b", "matmul_dtype"))
def qnetwork_forward(x, params, *, tile_b=256, matmul_dtype=jnp.bfloat16):
    """Fused 3-layer MLP forward, tiled over the batch dimension."""
    w1, b1, w2, b2, w3, b3 = params
    B, state_dim = x.shape
    hidden = w1.shape[1]
    action_dim = w3.shape[1]

    # (1) Lane-dense output: pad fc3 out columns to a multiple of 128 (zeros).
    out_cols = _round_up(action_dim, 128)
    if out_cols != action_dim:
        w3 = jnp.pad(w3, ((0, 0), (0, out_cols - action_dim)))
        b3 = jnp.pad(b3, ((0, 0), (0, out_cols - action_dim)))

    # (2) bf16 matmul operands: halves weight DMA bytes, 2x MXU rate on v6e/v7x.
    #     Biases stay f32 so bias-add/ReLU run as f32 VPU ops (v5e has no bf16 VALU).
    w1, w2, w3 = (w.astype(matmul_dtype) for w in (w1, w2, w3))

    # (3) Batch tile: 256 by default; shrink to a single full tile for small B
    #     (grid of 1 step -> no pipelining overhead).  Keep it sublane-aligned.
    tb = _round_up(min(tile_b, _round_up(B, 8)), 8)

    # (4) Pad B so every grid step is a full, unmasked tile (no vst.msk edge tile).
    b_pad = _round_up(B, tb)
    if b_pad != B:
        x = jnp.pad(x, ((0, b_pad - B), (0, 0)))

    grid = (b_pad // tb,)
    # NOTE: constant-index weight blocks are DMA'd once (not per step); default
    # double-buffering costs only ~2x68 KiB at hidden=128, so left as-is.
    full = lambda shape: pl.BlockSpec(shape, lambda i: (0, 0))

    out = pl.pallas_call(
        qnet_kernel,
        out_shape=jax.ShapeDtypeStruct((b_pad, out_cols), x.dtype),
        grid_spec=pltpu.PrefetchScalarGridSpec(
            num_scalar_prefetch=0,
            grid=grid,
            in_specs=[
                pl.BlockSpec((tb, state_dim), lambda i: (i, 0)),  # x tile
                full((state_dim, hidden)),                        # w1
                full((1, hidden)),                                # b1
                full((hidden, hidden)),                           # w2
                full((1, hidden)),                                # b2
                full((hidden, out_cols)),                         # w3 (lane-padded)
                full((1, out_cols)),                              # b3 (lane-padded)
            ],
            out_specs=pl.BlockSpec((tb, out_cols), lambda i: (i, 0)),
        ),
        # Parallel batch axis -> v7x shards grid steps across its 2 TensorCores.
        compiler_params=pltpu.CompilerParams(
            dimension_semantics=("parallel",)),
    )(x, w1, b1, w2, b2, w3, b3)

    return out[:B, :action_dim]


def qnetwork_reference(x, params, matmul_dtype=jnp.float32):
    """Pure-JAX reference with optional matmul-operand cast (mirrors kernel)."""
    w1, b1, w2, b2, w3, b3 = params
    md = matmul_dtype
    h1 = jnp.maximum(jnp.dot(x.astype(md), w1.astype(md),
                             preferred_element_type=jnp.float32) + b1, 0.0)
    h2 = jnp.maximum(jnp.dot(h1.astype(md), w2.astype(md),
                             preferred_element_type=jnp.float32) + b2, 0.0)
    return jnp.dot(h2.astype(md), w3.astype(md),
                   preferred_element_type=jnp.float32) + b3


def init_params(key, state_dim, action_dim, hidden=128, dtype=jnp.float32):
    """Deterministic init mimicking nn.Linear's U(-1/sqrt(fan_in), 1/sqrt(fan_in))."""
    ks = jax.random.split(key, 6)

    def lin(kw, kb, fan_in, fan_out):
        bound = 1.0 / jnp.sqrt(fan_in)
        w = jax.random.uniform(kw, (fan_in, fan_out), dtype, -bound, bound)
        b = jax.random.uniform(kb, (1, fan_out), dtype, -bound, bound)
        return w, b

    w1, b1 = lin(ks[0], ks[1], state_dim, hidden)
    w2, b2 = lin(ks[2], ks[3], hidden, hidden)
    w3, b3 = lin(ks[4], ks[5], hidden, action_dim)
    return (w1, b1, w2, b2, w3, b3)


if __name__ == "__main__":
    key = jax.random.PRNGKey(0)
    k_x, k_p = jax.random.split(key)

    # B=300 exercises the batch-padding path (tile 256 -> padded B=512, grid=2).
    B, state_dim, action_dim = 300, 8, 4
    x = jax.random.normal(k_x, (B, state_dim), jnp.float32)
    params = init_params(k_p, state_dim, action_dim)

    out = qnetwork_forward(x, params)
    out = jax.block_until_ready(out)
    assert out.shape == (B, action_dim)

    # Tight check vs. a reference using the same bf16 matmul operands,
    # loose check vs. the pure-f32 reference (bf16 rounding noise only).
    ref_bf16 = qnetwork_reference(x, params, matmul_dtype=jnp.bfloat16)
    ref_f32 = qnetwork_reference(x, params, matmul_dtype=jnp.float32)
    assert jnp.allclose(out, ref_bf16, atol=1e-2, rtol=1e-2), \
        float(jnp.max(jnp.abs(out - ref_bf16)))
    assert jnp.allclose(out, ref_f32, atol=8e-2, rtol=8e-2), \
        float(jnp.max(jnp.abs(out - ref_f32)))

    print("KERNEL_OK")
</pallas_src>

<mosaic_0001>
module attributes {stable_mosaic.version = 11 : i64} {
  func.func @qnet_kernel(%arg0: i32, %arg1: memref<256x8xf32, #tpu.memory_space<vmem>>, %arg2: memref<8x128xbf16, #tpu.memory_space<vmem>>, %arg3: memref<1x128xf32, #tpu.memory_space<vmem>>, %arg4: memref<128x128xbf16, #tpu.memory_space<vmem>>, %arg5: memref<1x128xf32, #tpu.memory_space<vmem>>, %arg6: memref<128x128xbf16, #tpu.memory_space<vmem>>, %arg7: memref<1x128xf32, #tpu.memory_space<vmem>>, %arg8: memref<256x128xf32, #tpu.memory_space<vmem>>) attributes {dimension_semantics = [#tpu.dimension_semantics<parallel>], iteration_bounds = array<i64: 2>, scalar_prefetch = 0 : i64, scratch_operands = 0 : i64, tpu.core_type = #tpu.core_type<tc>, window_params = [{transform_indices = @transform_0, window_bounds = array<i64: 256, 8>}, {pipeline_mode = #tpu.pipeline_mode<synchronous>, transform_indices = @transform_1, window_bounds = array<i64: 8, 128>}, {pipeline_mode = #tpu.pipeline_mode<synchronous>, transform_indices = @transform_2, window_bounds = array<i64: 1, 128>}, {pipeline_mode = #tpu.pipeline_mode<synchronous>, transform_indices = @transform_3, window_bounds = array<i64: 128, 128>}, {pipeline_mode = #tpu.pipeline_mode<synchronous>, transform_indices = @transform_4, window_bounds = array<i64: 1, 128>}, {pipeline_mode = #tpu.pipeline_mode<synchronous>, transform_indices = @transform_5, window_bounds = array<i64: 128, 128>}, {pipeline_mode = #tpu.pipeline_mode<synchronous>, transform_indices = @transform_6, window_bounds = array<i64: 1, 128>}, {transform_indices = @transform_7, window_bounds = array<i64: 256, 128>}]} {
    %c0 = arith.constant 0 : index
    %c0_0 = arith.constant 0 : index
    %0 = vector.load %arg1[%c0, %c0_0] : memref<256x8xf32, #tpu.memory_space<vmem>>, vector<256x8xf32>
    %1 = arith.truncf %0 : vector<256x8xf32> to vector<256x8xbf16>
    %c0_1 = arith.constant 0 : index
    %c0_2 = arith.constant 0 : index
    %2 = vector.load %arg2[%c0_1, %c0_2] : memref<8x128xbf16, #tpu.memory_space<vmem>>, vector<8x128xbf16>
    %cst = arith.constant dense<0.000000e+00> : vector<256x128xf32>
    %3 = tpu.matmul %1, %2, %cst {dimension_numbers = #tpu.dot_dimension_numbers<[1], [0], [0], [1], [0, 0, 1, 1], [], []>} : vector<256x8xbf16>, vector<8x128xbf16>, vector<256x128xf32> -> vector<256x128xf32>
    %c0_3 = arith.constant 0 : index
    %c0_4 = arith.constant 0 : index
    %4 = vector.load %arg3[%c0_3, %c0_4] : memref<1x128xf32, #tpu.memory_space<vmem>>, vector<1x128xf32>
    %5 = vector.broadcast %4 : vector<1x128xf32> to vector<256x128xf32>
    %6 = arith.addf %3, %5 : vector<256x128xf32>
    %cst_5 = arith.constant 0.000000e+00 : f32
    %7 = vector.broadcast %cst_5 : f32 to vector<256x128xf32>
    %8 = arith.maximumf %6, %7 : vector<256x128xf32>
    %9 = arith.truncf %8 : vector<256x128xf32> to vector<256x128xbf16>
    %c0_6 = arith.constant 0 : index
    %c0_7 = arith.constant 0 : index
    %10 = vector.load %arg4[%c0_6, %c0_7] : memref<128x128xbf16, #tpu.memory_space<vmem>>, vector<128x128xbf16>
    %cst_8 = arith.constant dense<0.000000e+00> : vector<256x128xf32>
    %11 = tpu.matmul %9, %10, %cst_8 {dimension_numbers = #tpu.dot_dimension_numbers<[1], [0], [0], [1], [0, 0, 1, 1], [], []>} : vector<256x128xbf16>, vector<128x128xbf16>, vector<256x128xf32> -> vector<256x128xf32>
    %c0_9 = arith.constant 0 : index
    %c0_10 = arith.constant 0 : index
    %12 = vector.load %arg5[%c0_9, %c0_10] : memref<1x128xf32, #tpu.memory_space<vmem>>, vector<1x128xf32>
    %13 = vector.broadcast %12 : vector<1x128xf32> to vector<256x128xf32>
    %14 = arith.addf %11, %13 : vector<256x128xf32>
    %cst_11 = arith.constant 0.000000e+00 : f32
    %15 = vector.broadcast %cst_11 : f32 to vector<256x128xf32>
    %16 = arith.maximumf %14, %15 : vector<256x128xf32>
    %17 = arith.truncf %16 : vector<256x128xf32> to vector<256x128xbf16>
    %c0_12 = arith.constant 0 : index
    %c0_13 = arith.constant 0 : index
    %18 = vector.load %arg6[%c0_12, %c0_13] : memref<128x128xbf16, #tpu.memory_space<vmem>>, vector<128x128xbf16>
    %cst_14 = arith.constant dense<0.000000e+00> : vector<256x128xf32>
    %19 = tpu.matmul %17, %18, %cst_14 {dimension_numbers = #tpu.dot_dimension_numbers<[1], [0], [0], [1], [0, 0, 1, 1], [], []>} : vector<256x128xbf16>, vector<128x128xbf16>, vector<256x128xf32> -> vector<256x128xf32>
    %c0_15 = arith.constant 0 : index
    %c0_16 = arith.constant 0 : index
    %20 = vector.load %arg7[%c0_15, %c0_16] : memref<1x128xf32, #tpu.memory_space<vmem>>, vector<1x128xf32>
    %21 = vector.broadcast %20 : vector<1x128xf32> to vector<256x128xf32>
    %22 = arith.addf %19, %21 : vector<256x128xf32>
    %c0_17 = arith.constant 0 : index
    %c0_18 = arith.constant 0 : index
    %23 = vector.load %arg8[%c0_17, %c0_18] : memref<256x128xf32, #tpu.memory_space<vmem>>, vector<256x128xf32>
    tpu.vector_store %arg8[%c0_17, %c0_18], %22 {strides = array<i32>} : memref<256x128xf32, #tpu.memory_space<vmem>>, vector<256x128xf32>,
    return
  }
  func.func @transform_0(%arg0: i32) -> (i32, i32) {
    %c0_i32 = arith.constant 0 : i32
    %c0_i32_0 = arith.constant 0 : i32
    return %arg0, %c0_i32 : i32, i32
  }
  func.func @transform_1(%arg0: i32) -> (i32, i32) {
    %c0_i32 = arith.constant 0 : i32
    %c0_i32_0 = arith.constant 0 : i32
    %c0_i32_1 = arith.constant 0 : i32
    return %c0_i32, %c0_i32_0 : i32, i32
  }
  func.func @transform_2(%arg0: i32) -> (i32, i32) {
    %c0_i32 = arith.constant 0 : i32
    %c0_i32_0 = arith.constant 0 : i32
    %c0_i32_1 = arith.constant 0 : i32
    return %c0_i32, %c0_i32_0 : i32, i32
  }
  func.func @transform_3(%arg0: i32) -> (i32, i32) {
    %c0_i32 = arith.constant 0 : i32
    %c0_i32_0 = arith.constant 0 : i32
    %c0_i32_1 = arith.constant 0 : i32
    return %c0_i32, %c0_i32_0 : i32, i32
  }
  func.func @transform_4(%arg0: i32) -> (i32, i32) {
    %c0_i32 = arith.constant 0 : i32
    %c0_i32_0 = arith.constant 0 : i32
    %c0_i32_1 = arith.constant 0 : i32
    return %c0_i32, %c0_i32_0 : i32, i32
  }
  func.func @transform_5(%arg0: i32) -> (i32, i32) {
    %c0_i32 = arith.constant 0 : i32
    %c0_i32_0 = arith.constant 0 : i32
    %c0_i32_1 = arith.constant 0 : i32
    return %c0_i32, %c0_i32_0 : i32, i32
  }
  func.func @transform_6(%arg0: i32) -> (i32, i32) {
    %c0_i32 = arith.constant 0 : i32
    %c0_i32_0 = arith.constant 0 : i32
    %c0_i32_1 = arith.constant 0 : i32
    return %c0_i32, %c0_i32_0 : i32, i32
  }
  func.func @transform_7(%arg0: i32) -> (i32, i32) {
    %c0_i32 = arith.constant 0 : i32
    %c0_i32_0 = arith.constant 0 : i32
    return %arg0, %c0_i32 : i32, i32
  }
}

</mosaic_0001>

<bundles_post_ra>
// kernel: qnetwork_forward.1
= control target key start
LH: loop header
LB: loop body
LE: loop exit
PB: predicated region body
PF: predicated region fallthrough
CT: control target
= control target key end

     0   :  { %s1159_s24 = smov 0   ;;  %s1429_s0 = inlined_call_operand.vmem [shape: f32[512,8], index: 0, kind: input, shape index: {}]   ;;  %s1430_s1 = inlined_call_operand.vmem [shape: bf16[8,128], index: 1, kind: input, shape index: {}]   ;;  %s1431_s2 = inlined_call_operand.vmem [shape: f32[1,128], index: 2, kind: input, shape index: {}]   ;;  %s1432_s3 = inlined_call_operand.vmem [shape: bf16[128,128], index: 3, kind: input, shape index: {}]   ;;  %s1433_s4 = inlined_call_operand.vmem [shape: f32[1,128], index: 4, kind: input, shape index: {}]   ;;  %s1434_s5 = inlined_call_operand.vmem [shape: bf16[128,128], index: 5, kind: input, shape index: {}]   ;;  %s1435_s6 = inlined_call_operand.vmem [shape: f32[1,128], index: 6, kind: input, shape index: {}]   ;;  %s1436_s7 = inlined_call_operand.vmem [shape: f32[512,128], index: 7, kind: output, shape index: {}]  }
   0x1 LB: > { %s976_s25 = sadd.s32 4294967295, %s1117_s24   ;;  %p980_p0 = scmp.ge.s32.totalorder %s1117_s24, 1  ;;  %s1117_s24 = sphi %s1159_s24, %s17_s24  }
   0x2   : > { %p238_p1 = scmp.lt.s32.totalorder %s1117_s24, 3 }
   0x4   : > { %p239_p2 = pnand %p980_p0, %p238_p1 }
   0x5   : > { %s981_s28 = sshll.u32 (!%p239_p2), %s976_s25, 5 }
   0x6   : > { %242 = sbr.rel (%p239_p2) target bundleno = 686 (0x2ae), region = 48  ;;  %p271_p3 = scmp.lt.s32.totalorder (!%p239_p2), %s981_s28, 63 }
   0xb   : > { %v331_v0 = vld [vmem:[%s1430_s1] sm:$0xf]  ;;  %vm385_vm0 = vcmask 1043456   ;;  %s1438_s28 = smov (!%p271_p3, %s981_s28), 63  ;;  %vm336_vm1 = vcmask 64512   ;;  %v1074_v17 = vld [vmem:[%s1432_s3 + $0x38] sm:$0xff] }
   0xc   : > { %v387_v1 = vsel %vm385_vm0, %v331_v0, 0  ;;  %s982_s29 = sshll.u32 %s1438_s28, 3  ;;  %594 = vmatpush.bf16.msra.mxu1 %v1074_v17  ;;  %v1073_v21 = vld [vmem:[%s1432_s3 + $0x30] sm:$0xff]  ;;  %v1072_v22 = vld [vmem:[%s1432_s3 + $0x28] sm:$0xff]  ;;  %v1071_v23 = vld [vmem:[%s1432_s3 + $0x20] sm:$0xff] }
   0xd   : > { %396 = vmatpush.bf16.msra.mxu0 %v387_v1  ;;  %1083 = vmatpush.bf16.msra.mxu3 %v387_v1  ;;  %s1178_s9 = scalar_lea.vmem %s1429_s0, %s982_s29  ;;  %v1070_v26 = vld [vmem:[%s1432_s3 + $0x18] sm:$0xff]  ;;  %v1069_v28 = vld [vmem:[%s1432_s3 + $0x10] sm:$0xff]  ;;  %v1068_v29 = vld [vmem:[%s1432_s3 + $0x8] sm:$0xff]  ;;  %s1346_s10 = scalar_lea.vmem %s1436_s7, %s982_s29 }
   0xe   : > { %v283_v2 = vld [vmem:[%s1178_s9] sm:$0xff]  ;;  %v284_v3 = vld [vmem:[%s1178_s9 + $0x8] sm:$0xff]  ;;  %v285_v5 = vld [vmem:[%s1178_s9 + $0x10] sm:$0xff] }
   0xf   : > { %v315_v4 = vpack.c.bf16 %v284_v3, %v283_v2  ;;  %v286_v6 = vld [vmem:[%s1178_s9 + $0x18] sm:$0xff]  ;;  %v287_v8 = vld [vmem:[%s1178_s9 + $0x20] sm:$0xff]  ;;  %v288_v9 = vld [vmem:[%s1178_s9 + $0x28] sm:$0xff] }
  0x10   : > { %v316_v7 = vpack.c.bf16 %v286_v6, %v285_v5  ;;  %v317_v10 = vpack.c.bf16 %v288_v9, %v287_v8  ;;  %v289_v11 = vld [vmem:[%s1178_s9 + $0x30] sm:$0xff]  ;;  %v290_v12 = vld [vmem:[%s1178_s9 + $0x38] sm:$0xff]  ;;  %v291_v14 = vld [vmem:[%s1178_s9 + $0x40] sm:$0xff]  ;;  %595 = vmatpush.bf16.msra.mxu1 %v1073_v21 }
  0x11   : > { %985 = vmatmul.msk.bf16.vlgmr.msra.gmra.mxu0 %vm336_vm1, %v315_v4  ;;  %v318_v13 = vpack.c.bf16 %v290_v12, %v289_v11  ;;  %v292_v15 = vld [vmem:[%s1178_s9 + $0x48] sm:$0xff]  ;;  %1084 = vmatpush.bf16.msrb.mxu3 %v1074_v17  ;;  %v293_v18 = vld [vmem:[%s1178_s9 + $0x50] sm:$0xff]  ;;  %v294_v19 = vld [vmem:[%s1178_s9 + $0x58] sm:$0xff] }
  0x12   : > { %v319_v16 = vpack.c.bf16 %v292_v15, %v291_v14  ;;  %v320_v20 = vpack.c.bf16 %v294_v19, %v293_v18  ;;  %v295_v24 = vld [vmem:[%s1178_s9 + $0x60] sm:$0xff]  ;;  %v296_v25 = vld [vmem:[%s1178_s9 + $0x68] sm:$0xff]  ;;  %v297_v31 = vld [vmem:[%s1178_s9 + $0x70] sm:$0xff] }
  0x13   : > { %v321_v27 = vpack.c.bf16 %v296_v25, %v295_v24  ;;  %v1067_v30 = vld [vmem:[%s1432_s3] sm:$0xff]  ;;  %v298_v32 = vld [vmem:[%s1178_s9 + $0x78] sm:$0xff]  ;;  %v300_v35 = vld [vmem:[%s1178_s9 + $0x88] sm:$0xff] }
  0x14   : > { %596 = vmatpush.bf16.msra.mxu1 %v1072_v22  ;;  %v322_v33 = vpack.c.bf16 %v298_v32, %v297_v31  ;;  %v299_v34 = vld [vmem:[%s1178_s9 + $0x80] sm:$0xff]  ;;  %v301_v44 = vld [vmem:[%s1178_s9 + $0x90] sm:$0xff]  ;;  %v302_v45 = vld [vmem:[%s1178_s9 + $0x98] sm:$0xff] }
  0x15   : > { %1085 = vmatpush.bf16.msrb.mxu3 %v1073_v21  ;;  %v323_v36 = vpack.c.bf16 %v300_v35, %v299_v34  ;;  %v1233_v38 = vld [vmem:[%s1431_s2] ss:$0 sm:$0xff]  ;;  %v324_v47 = vpack.c.bf16 %v302_v45, %v301_v44  ;;  %v304_v55 = vld [vmem:[%s1178_s9 + $0xa8] sm:$0xff]  ;;  %v309_v59 = vld [vmem:[%s1178_s9 + $0xd0] sm:$0xff] }
  0x16   : > { %v303_v54 = vld [vmem:[%s1178_s9 + $0xa0] sm:$0xff]  ;;  %v310_v60 = vld [vmem:[%s1178_s9 + $0xd8] sm:$0xff]  ;;  %v305_v3 = vld [vmem:[%s1178_s9 + $0xb0] sm:$0xff] }
  0x17   : > { %v325_v57 = vpack.c.bf16 %v304_v55, %v303_v54  ;;  %v328_v61 = vpack.c.bf16 %v310_v60, %v309_v59  ;;  %v306_v4 = vld [vmem:[%s1178_s9 + $0xb8] sm:$0xff]  ;;  %v311_v8 = vld [vmem:[%s1178_s9 + $0xe0] sm:$0xff]  ;;  %v312_v9 = vld [vmem:[%s1178_s9 + $0xe8] sm:$0xff] }
  0x18   : > { %597 = vmatpush.bf16.msra.mxu1 %v1071_v23  ;;  %v326_v6 = vpack.c.bf16 %v306_v4, %v305_v3  ;;  %v308_v17 = vld [vmem:[%s1178_s9 + $0xc8] sm:$0xff]  ;;  %v313_v21 = vld [vmem:[%s1178_s9 + $0xf0] sm:$0xff]  ;;  %v1082_v34 = vld [vmem:[%s1434_s5 + $0x38] sm:$0xff] }
  0x19   : > { %1086 = vmatpush.bf16.msrb.mxu3 %v1072_v22  ;;  %v314_v22 = vld [vmem:[%s1178_s9 + $0xf8] sm:$0xff]  ;;  %799 = vmatpush.bf16.msra.mxu2 %v1082_v34  ;;  %v1302_v4 = vld [vmem:[%s1433_s4] ss:$0 sm:$0xff] }
  0x1a   : > { %998 = vmatmul.msk.bf16.vlgmr.msra.gmra.mxu3 %vm336_vm1, %v328_v61 }
  0x1c   : > { %598 = vmatpush.bf16.msra.mxu1 %v1070_v26 }
  0x1d   : > { %1087 = vmatpush.bf16.msrb.mxu3 %v1071_v23  ;;  %v330_v23 = vpack.c.bf16 %v314_v22, %v313_v21 }
  0x20   : > { %599 = vmatpush.bf16.msra.mxu1 %v1069_v28 }
  0x21   : > { %986 = vmatmul.msk.bf16.gmra.mxu0 %vm336_vm1, %v316_v7  ;;  %1088 = vmatpush.bf16.msrb.mxu3 %v1070_v26 }
  0x24   : > { %600 = vmatpush.bf16.msra.mxu1 %v1068_v29 }
  0x25   : > { %1089 = vmatpush.bf16.msrb.mxu3 %v1069_v28 }
  0x28   : > { %601 = vmatpush.bf16.msra.mxu1 %v1067_v30 }
  0x29   : > { %1090 = vmatpush.bf16.msrb.mxu3 %v1068_v29 }
  0x2d   : > { %1091 = vmatpush.bf16.msrb.mxu3 %v1067_v30 }
  0x31   : > { %987 = vmatmul.msk.bf16.gmra.mxu0 %vm336_vm1, %v317_v10  ;;  %v329_v10 = vpack.c.bf16 %v312_v9, %v311_v8  ;;  %1092 = vmatpush.bf16.msra.mxu3 %v1082_v34 }
  0x33   : > { %999 = vmatmul.msk.bf16.gmra.mxu3 %vm336_vm1, %v329_v10 }
  0x41   : > { %988 = vmatmul.msk.bf16.gmra.mxu0 %vm336_vm1, %v318_v13 }
  0x43   : > { %1000 = vmatmul.msk.bf16.gmra.mxu3 %vm336_vm1, %v330_v23 }
  0x51   : > { %989 = vmatmul.msk.bf16.gmra.mxu0 %vm336_vm1, %v319_v16  ;;  %v307_v16 = vld [vmem:[%s1178_s9 + $0xc0] sm:$0xff] }
  0x52   : > { %v327_v19 = vpack.c.bf16 %v308_v17, %v307_v16 }
  0x61   : > { %990 = vmatmul.msk.bf16.gmra.mxu0 %vm336_vm1, %v320_v20 }
  0x71   : > { %991 = vmatmul.msk.bf16.gmra.mxu0 %vm336_vm1, %v321_v27 }
  0x81   : > { %992 = vmatmul.msk.bf16.gmra.mxu0 %vm336_vm1, %v322_v33 }
  0x8e   : > { %v398_v37 = vpop.f32.mrf.mxu0 }
  0x8f   : > { %v399_v39 = vadd.f32 %v1233_v38, %v398_v37 }
  0x91   : > { %993 = vmatmul.msk.bf16.gmra.mxu0 %vm336_vm1, %v323_v36  ;;  %v478_v42 = vmax.f32 %v399_v39, 0.0  ;;  %v1081_v39 = vld [vmem:[%s1434_s5 + $0x30] sm:$0xff] }
  0x92   : > { %800 = vmatpush.bf16.msra.mxu2 %v1081_v39  ;;  %1093 = vmatpush.bf16.msra.mxu3 %v1081_v39 }
  0x96   : > { %v400_v40 = vpop.f32.mrf.mxu0 }
  0x97   : > { %v401_v41 = vadd.f32 %v1233_v38, %v400_v40 }
  0x99   : > { %v479_v43 = vmax.f32 %v401_v41, 0.0  ;;  %v1080_v41 = vld [vmem:[%s1434_s5 + $0x28] sm:$0xff] }
  0x9a   : > { %801 = vmatpush.bf16.msra.mxu2 %v1080_v41  ;;  %1094 = vmatpush.bf16.msra.mxu3 %v1080_v41 }
  0x9b   : > { %v510_v46 = vpack.c.bf16 %v479_v43, %v478_v42  ;;  %v1079_v42 = vld [vmem:[%s1434_s5 + $0x20] sm:$0xff] }
  0x9d   : > { %602 = vmatmul.bf16.vlgmr.msra.gmra.mxu1 %v510_v46  ;;  %v1078_v46 = vld [vmem:[%s1434_s5 + $0x18] sm:$0xff] }
  0x9e   : > { %v403_v48 = vpop.f32.mrf.mxu0  ;;  %802 = vmatpush.bf16.msra.mxu2 %v1079_v42  ;;  %1095 = vmatpush.bf16.msra.mxu3 %v1079_v42 }
  0x9f   : > { %v404_v49 = vadd.f32 %v1233_v38, %v403_v48 }
  0xa1   : > { %994 = vmatmul.msk.bf16.gmra.mxu0 %vm336_vm1, %v324_v47  ;;  %v480_v52 = vmax.f32 %v404_v49, 0.0 }
  0xa2   : > { %803 = vmatpush.bf16.msra.mxu2 %v1078_v46  ;;  %1096 = vmatpush.bf16.msra.mxu3 %v1078_v46 }
  0xa6   : > { %v405_v50 = vpop.f32.mrf.mxu0 }
  0xa7   : > { %v406_v51 = vadd.f32 %v1233_v38, %v405_v50  ;;  %v1077_v50 = vld [vmem:[%s1434_s5 + $0x10] sm:$0xff] }
  0xa8   : > { %804 = vmatpush.bf16.msra.mxu2 %v1077_v50  ;;  %1097 = vmatpush.bf16.msra.mxu3 %v1077_v50 }
  0xa9   : > { %v481_v53 = vmax.f32 %v406_v51, 0.0 }
  0xab   : > { %v511_v56 = vpack.c.bf16 %v481_v53, %v480_v52  ;;  %v1076_v52 = vld [vmem:[%s1434_s5 + $0x8] sm:$0xff]  ;;  %v1075_v53 = vld [vmem:[%s1434_s5] sm:$0xff] }
  0xac   : > { %805 = vmatpush.bf16.msra.mxu2 %v1076_v52  ;;  %1098 = vmatpush.bf16.msra.mxu3 %v1076_v52 }
  0xad   : > { %607 = vmatmul.bf16.gmra.mxu1 %v511_v56 }
  0xae   : > { %v408_v58 = vpop.f32.mrf.mxu0 }
  0xaf   : > { %v409_v62 = vadd.f32 %v1233_v38, %v408_v58 }
  0xb0   : > { %806 = vmatpush.bf16.msra.mxu2 %v1075_v53  ;;  %1099 = vmatpush.bf16.msra.mxu3 %v1075_v53 }
  0xb1   : > { %995 = vmatmul.msk.bf16.gmra.mxu0 %vm336_vm1, %v325_v57  ;;  %v482_v1 = vmax.f32 %v409_v62, 0.0 }
  0xb6   : > { %v410_v63 = vpop.f32.mrf.mxu0 }
  0xb7   : > { %v411_v0 = vadd.f32 %v1233_v38, %v410_v63 }
  0xb9   : > { %v483_v2 = vmax.f32 %v411_v0, 0.0 }
  0xbb   : > { %v512_v5 = vpack.c.bf16 %v483_v2, %v482_v1 }
  0xbd   : > { %612 = vmatmul.bf16.gmra.mxu1 %v512_v5 }
  0xbe   : > { %v413_v7 = vpop.f32.mrf.mxu0 }
  0xbf   : > { %v414_v11 = vadd.f32 %v1233_v38, %v413_v7 }
  0xc1   : > { %996 = vmatmul.msk.bf16.gmra.mxu0 %vm336_vm1, %v326_v6  ;;  %v484_v14 = vmax.f32 %v414_v11, 0.0 }
  0xc6   : > { %v415_v12 = vpop.f32.mrf.mxu0 }
  0xc7   : > { %v416_v13 = vadd.f32 %v1233_v38, %v415_v12 }
  0xc9   : > { %v485_v15 = vmax.f32 %v416_v13, 0.0 }
  0xcb   : > { %v513_v18 = vpack.c.bf16 %v485_v15, %v484_v14 }
  0xcd   : > { %617 = vmatmul.bf16.gmra.mxu1 %v513_v18 }
  0xce   : > { %v418_v20 = vpop.f32.mrf.mxu0 }
  0xcf   : > { %v419_v24 = vadd.f32 %v1233_v38, %v418_v20 }
  0xd1   : > { %997 = vmatmul.msk.bf16.gmra.mxu0 %vm336_vm1, %v327_v19  ;;  %v486_v27 = vmax.f32 %v419_v24, 0.0 }
  0xd6   : > { %v420_v25 = vpop.f32.mrf.mxu0 }
  0xd7   : > { %v421_v26 = vadd.f32 %v1233_v38, %v420_v25 }
  0xd9   : > { %v487_v28 = vmax.f32 %v421_v26, 0.0 }
  0xdb   : > { %v514_v29 = vpack.c.bf16 %v487_v28, %v486_v27 }
  0xdd   : > { %622 = vmatmul.bf16.gmra.mxu1 %v514_v29 }
  0xde   : > { %v423_v30 = vpop.f32.mrf.mxu0 }
  0xdf   : > { %v424_v31 = vadd.f32 %v1233_v38, %v423_v30 }
  0xe1   : > { %v488_v35 = vmax.f32 %v424_v31, 0.0 }
  0xe6   : > { %v425_v32 = vpop.f32.mrf.mxu0 }
  0xe7   : > { %v426_v33 = vadd.f32 %v1233_v38, %v425_v32 }
  0xe9   : > { %v489_v36 = vmax.f32 %v426_v33, 0.0 }
  0xeb   : > { %v515_v37 = vpack.c.bf16 %v489_v36, %v488_v35 }
  0xed   : > { %627 = vmatmul.bf16.gmra.mxu1 %v515_v37 }
  0xee   : > { %v428_v40 = vpop.f32.mrf.mxu0 }
  0xef   : > { %v429_v43 = vadd.f32 %v1233_v38, %v428_v40 }
  0xf1   : > { %v490_v47 = vmax.f32 %v429_v43, 0.0 }
  0xf6   : > { %v430_v44 = vpop.f32.mrf.mxu0 }
  0xf7   : > { %v431_v45 = vadd.f32 %v1233_v38, %v430_v44 }
  0xf9   : > { %v491_v48 = vmax.f32 %v431_v45, 0.0 }
  0xfb   : > { %v516_v49 = vpack.c.bf16 %v491_v48, %v490_v47 }
  0xfd   : > { %632 = vmatmul.bf16.gmra.mxu1 %v516_v49  ;;  %v463_v49 = vpop.f32.mrf.mxu3 }
  0xfe   : > { %v433_v51 = vpop.f32.mrf.mxu0 }
  0xff   : > { %v434_v54 = vadd.f32 %v1233_v38, %v433_v51 }
 0x101   : > { %v492_v57 = vmax.f32 %v434_v54, 0.0 }
 0x106   : > { %v435_v55 = vpop.f32.mrf.mxu0 }
 0x107   : > { %v436_v56 = vadd.f32 %v1233_v38, %v435_v55 }
 0x109   : > { %v493_v58 = vmax.f32 %v436_v56, 0.0 }
 0x10b   : > { %v517_v59 = vpack.c.bf16 %v493_v58, %v492_v57 }
 0x10d   : > { %637 = vmatmul.bf16.gmra.mxu1 %v517_v59  ;;  %v465_v59 = vpop.f32.mrf.mxu3 }
 0x10e   : > { %v438_v60 = vpop.f32.mrf.mxu0 }
 0x10f   : > { %v439_v61 = vadd.f32 %v1233_v38, %v438_v60 }
 0x111   : > { %v494_v0 = vmax.f32 %v439_v61, 0.0 }
 0x116   : > { %v440_v62 = vpop.f32.mrf.mxu0 }
 0x117   : > { %v441_v63 = vadd.f32 %v1233_v38, %v440_v62 }
 0x119   : > { %v495_v1 = vmax.f32 %v441_v63, 0.0 }
 0x11a   : > { %v603_v2 = vpop.f32.mrf.mxu1 }
 0x11b   : > { %v518_v3 = vpack.c.bf16 %v495_v1, %v494_v0  ;;  %v604_v6 = vadd.f32 %v1302_v4, %v603_v2  ;;  %v468_v2 = vpop.f32.mrf.mxu3 }
 0x11d   : > { %642 = vmatmul.bf16.gmra.mxu1 %v518_v3  ;;  %v683_v9 = vmax.f32 %v604_v6, 0.0  ;;  %v464_v3 = vadd.f32 %v1233_v38, %v463_v49 }
 0x11e   : > { %v443_v5 = vpop.f32.mrf.mxu0 }
 0x11f   : > { %v444_v10 = vadd.f32 %v1233_v38, %v443_v5  ;;  %v466_v5 = vadd.f32 %v1233_v38, %v465_v59 }
 0x121   : > { %v496_v15 = vmax.f32 %v444_v10, 0.0  ;;  %v505_v10 = vmax.f32 %v466_v5, 0.0 }
 0x122   : > { %v605_v7 = vpop.f32.mrf.mxu1 }
 0x123   : > { %v606_v8 = vadd.f32 %v1302_v4, %v605_v7 }
 0x125   : > { %v684_v11 = vmax.f32 %v606_v8, 0.0 }
 0x126   : > { %v445_v12 = vpop.f32.mrf.mxu0 }
 0x127   : > { %v446_v13 = vadd.f32 %v1233_v38, %v445_v12  ;;  %v715_v14 = vpack.c.bf16 %v684_v11, %v683_v9  ;;  %v504_v9 = vmax.f32 %v464_v3, 0.0 }
 0x129   : > { %v497_v16 = vmax.f32 %v446_v13, 0.0  ;;  %807 = vmatmul.bf16.vlgmr.msra.gmra.mxu2 %v715_v14  ;;  %v523_v13 = vpack.c.bf16 %v505_v10, %v504_v9  ;;  %v470_v14 = vpop.f32.mrf.mxu3 }
 0x12a   : > { %v608_v17 = vpop.f32.mrf.mxu1 }
 0x12b   : > { %v519_v18 = vpack.c.bf16 %v497_v16, %v496_v15  ;;  %v609_v20 = vadd.f32 %v1302_v4, %v608_v17  ;;  %v469_v17 = vadd.f32 %v1233_v38, %v468_v2 }
 0x12d   : > { %647 = vmatmul.bf16.gmra.mxu1 %v519_v18  ;;  %v685_v23 = vmax.f32 %v609_v20, 0.0  ;;  %v471_v18 = vadd.f32 %v1233_v38, %v470_v14 }
 0x12e   : > { %v448_v19 = vpop.f32.mrf.mxu0 }
 0x12f   : > { %v449_v24 = vadd.f32 %v1233_v38, %v448_v19 }
 0x131   : > { %v498_v29 = vmax.f32 %v449_v24, 0.0  ;;  %v507_v24 = vmax.f32 %v471_v18, 0.0 }
 0x132   : > { %v610_v21 = vpop.f32.mrf.mxu1 }
 0x133   : > { %v611_v22 = vadd.f32 %v1302_v4, %v610_v21 }
 0x135   : > { %v686_v25 = vmax.f32 %v611_v22, 0.0  ;;  %v473_v22 = vpop.f32.mrf.mxu3 }
 0x136   : > { %v450_v26 = vpop.f32.mrf.mxu0 }
 0x137   : > { %v451_v27 = vadd.f32 %v1233_v38, %v450_v26  ;;  %v716_v28 = vpack.c.bf16 %v686_v25, %v685_v23  ;;  %v506_v23 = vmax.f32 %v469_v17, 0.0 }
 0x139   : > { %v499_v30 = vmax.f32 %v451_v27, 0.0  ;;  %812 = vmatmul.bf16.gmra.mxu2 %v716_v28  ;;  %v524_v27 = vpack.c.bf16 %v507_v24, %v506_v23 }
 0x13a   : > { %v613_v31 = vpop.f32.mrf.mxu1 }
 0x13b   : > { %v520_v32 = vpack.c.bf16 %v499_v30, %v498_v29  ;;  %v614_v34 = vadd.f32 %v1302_v4, %v613_v31  ;;  %v474_v31 = vadd.f32 %v1233_v38, %v473_v22 }
 0x13d   : > { %652 = vmatmul.bf16.gmra.mxu1 %v520_v32  ;;  %v687_v37 = vmax.f32 %v614_v34, 0.0  ;;  %v475_v28 = vpop.f32.mrf.mxu3 }
 0x13e   : > { %v453_v33 = vpop.f32.mrf.mxu0  ;;  %v476_v32 = vadd.f32 %v1233_v38, %v475_v28 }
 0x13f   : > { %v454_v39 = vadd.f32 %v1233_v38, %v453_v33 }
 0x141   : > { %v500_v44 = vmax.f32 %v454_v39, 0.0 }
 0x142   : > { %v615_v35 = vpop.f32.mrf.mxu1 }
 0x143   : > { %v616_v36 = vadd.f32 %v1302_v4, %v615_v35 }
 0x145   : > { %v688_v40 = vmax.f32 %v616_v36, 0.0  ;;  %v508_v36 = vmax.f32 %v474_v31, 0.0 }
 0x146   : > { %v455_v41 = vpop.f32.mrf.mxu0 }
 0x147   : > { %v456_v42 = vadd.f32 %v1233_v38, %v455_v41  ;;  %v717_v43 = vpack.c.bf16 %v688_v40, %v687_v37  ;;  %v509_v37 = vmax.f32 %v476_v32, 0.0 }
 0x149   : > { %v501_v45 = vmax.f32 %v456_v42, 0.0  ;;  %817 = vmatmul.bf16.gmra.mxu2 %v717_v43  ;;  %v525_v41 = vpack.c.bf16 %v509_v37, %v508_v36 }
 0x14a   : > { %v618_v46 = vpop.f32.mrf.mxu1 }
 0x14b   : > { %v521_v47 = vpack.c.bf16 %v501_v45, %v500_v44  ;;  %v619_v50 = vadd.f32 %v1302_v4, %v618_v46 }
 0x14d   : > { %657 = vmatmul.bf16.gmra.mxu1 %v521_v47  ;;  %v689_v53 = vmax.f32 %v619_v50, 0.0 }
 0x14e   : > { %v458_v48 = vpop.f32.mrf.mxu0 }
 0x14f   : > { %v459_v54 = vadd.f32 %v1233_v38, %v458_v48 }
 0x151   : > { %v502_v60 = vmax.f32 %v459_v54, 0.0  ;;  %v1339_v54 = vld [vmem:[%s1435_s6] ss:$0 sm:$0xff] }
 0x152   : > { %v620_v51 = vpop.f32.mrf.mxu1 }
 0x153   : > { %v621_v52 = vadd.f32 %v1302_v4, %v620_v51 }
 0x155   : > { %v690_v55 = vmax.f32 %v621_v52, 0.0 }
 0x156   : > { %v460_v56 = vpop.f32.mrf.mxu0 }
 0x157   : > { %v461_v57 = vadd.f32 %v1233_v38, %v460_v56  ;;  %v718_v58 = vpack.c.bf16 %v690_v55, %v689_v53 }
 0x159   : > { %v503_v61 = vmax.f32 %v461_v57, 0.0  ;;  %822 = vmatmul.bf16.gmra.mxu2 %v718_v58 }
 0x15a   : > { %v623_v62 = vpop.f32.mrf.mxu1 }
 0x15b   : > { %v522_v63 = vpack.c.bf16 %v503_v61, %v502_v60  ;;  %v624_v0 = vadd.f32 %v1302_v4, %v623_v62 }
 0x15d   : > { %662 = vmatmul.bf16.vlgmr.msrb.gmra.mxu3 %v522_v63  ;;  %v691_v7 = vmax.f32 %v624_v0, 0.0 }
 0x162   : > { %v625_v1 = vpop.f32.mrf.mxu1 }
 0x163   : > { %v626_v6 = vadd.f32 %v1302_v4, %v625_v1 }
 0x165   : > { %v692_v8 = vmax.f32 %v626_v6, 0.0 }
 0x167   : > { %v719_v11 = vpack.c.bf16 %v692_v8, %v691_v7 }
 0x169   : > { %827 = vmatmul.bf16.gmra.mxu2 %v719_v11 }
 0x16a   : > { %v628_v12 = vpop.f32.mrf.mxu1 }
 0x16b   : > { %v629_v15 = vadd.f32 %v1302_v4, %v628_v12 }
 0x16d   : > { %667 = vmatmul.bf16.gmra.mxu3 %v523_v13  ;;  %v693_v20 = vmax.f32 %v629_v15, 0.0 }
 0x172   : > { %v630_v16 = vpop.f32.mrf.mxu1 }
 0x173   : > { %v631_v19 = vadd.f32 %v1302_v4, %v630_v16 }
 0x175   : > { %v694_v21 = vmax.f32 %v631_v19, 0.0 }
 0x177   : > { %v720_v25 = vpack.c.bf16 %v694_v21, %v693_v20 }
 0x179   : > { %832 = vmatmul.bf16.gmra.mxu2 %v720_v25 }
 0x17a   : > { %v633_v26 = vpop.f32.mrf.mxu1 }
 0x17b   : > { %v634_v29 = vadd.f32 %v1302_v4, %v633_v26 }
 0x17d   : > { %672 = vmatmul.bf16.gmra.mxu3 %v524_v27  ;;  %v695_v34 = vmax.f32 %v634_v29, 0.0 }
 0x182   : > { %v635_v30 = vpop.f32.mrf.mxu1 }
 0x183   : > { %v636_v33 = vadd.f32 %v1302_v4, %v635_v30 }
 0x185   : > { %v696_v35 = vmax.f32 %v636_v33, 0.0 }
 0x187   : > { %v721_v39 = vpack.c.bf16 %v696_v35, %v695_v34 }
 0x189   : > { %837 = vmatmul.bf16.gmra.mxu2 %v721_v39 }
 0x18a   : > { %v638_v40 = vpop.f32.mrf.mxu1 }
 0x18b   : > { %v639_v42 = vadd.f32 %v1302_v4, %v638_v40 }
 0x18d   : > { %677 = vmatmul.bf16.gmra.mxu3 %v525_v41  ;;  %v697_v45 = vmax.f32 %v639_v42, 0.0 }
 0x192   : > { %v640_v43 = vpop.f32.mrf.mxu1 }
 0x193   : > { %v641_v44 = vadd.f32 %v1302_v4, %v640_v43 }
 0x195   : > { %v698_v46 = vmax.f32 %v641_v44, 0.0 }
 0x197   : > { %v722_v38 = vpack.c.bf16 %v698_v46, %v697_v45 }
 0x199   : > { %842 = vmatmul.bf16.gmra.mxu2 %v722_v38 }
 0x19a   : > { %v643_v47 = vpop.f32.mrf.mxu1 }
 0x19b   : > { %v644_v48 = vadd.f32 %v1302_v4, %v643_v47 }
 0x19d   : > { %v699_v51 = vmax.f32 %v644_v48, 0.0 }
 0x1a2   : > { %v645_v49 = vpop.f32.mrf.mxu1 }
 0x1a3   : > { %v646_v50 = vadd.f32 %v1302_v4, %v645_v49 }
 0x1a5   : > { %v700_v52 = vmax.f32 %v646_v50, 0.0 }
 0x1a7   : > { %v723_v53 = vpack.c.bf16 %v700_v52, %v699_v51 }
 0x1a9   : > { %847 = vmatmul.bf16.gmra.mxu2 %v723_v53 }
 0x1aa   : > { %v648_v55 = vpop.f32.mrf.mxu1 }
 0x1ab   : > { %v649_v58 = vadd.f32 %v1302_v4, %v648_v55 }
 0x1ac   : > { %v808_v56 = vpop.f32.mrf.mxu2 }
 0x1ad   : > { %v809_v57 = vadd.f32 %v1339_v54, %v808_v56  ;;  %v701_v62 = vmax.f32 %v649_v58, 0.0 }
 0x1af   : > { %888 = vst [vmem:[%s1346_s10] sm:$0xff] %v809_v57 }
 0x1b2   : > { %v650_v59 = vpop.f32.mrf.mxu1 }
 0x1b3   : > { %v651_v60 = vadd.f32 %v1302_v4, %v650_v59 }
 0x1b4   : > { %v810_v61 = vpop.f32.mrf.mxu2 }
 0x1b5   : > { %v702_v63 = vmax.f32 %v651_v60, 0.0  ;;  %v811_v0 = vadd.f32 %v1339_v54, %v810_v61 }
 0x1b7   : > { %889 = vst [vmem:[%s1346_s10 + $0x8] sm:$0xff] %v811_v0  ;;  %v724_v1 = vpack.c.bf16 %v702_v63, %v701_v62 }
 0x1b9   : > { %852 = vmatmul.bf16.gmra.mxu2 %v724_v1 }
 0x1ba   : > { %v653_v2 = vpop.f32.mrf.mxu1 }
 0x1bb   : > { %v654_v6 = vadd.f32 %v1302_v4, %v653_v2 }
 0x1bc   : > { %v813_v3 = vpop.f32.mrf.mxu2 }
 0x1bd   : > { %v814_v5 = vadd.f32 %v1339_v54, %v813_v3  ;;  %v703_v10 = vmax.f32 %v654_v6, 0.0 }
 0x1bf   : > { %890 = vst [vmem:[%s1346_s10 + $0x10] sm:$0xff] %v814_v5 }
 0x1c2   : > { %v655_v7 = vpop.f32.mrf.mxu1 }
 0x1c3   : > { %v656_v8 = vadd.f32 %v1302_v4, %v655_v7 }
 0x1c4   : > { %v815_v9 = vpop.f32.mrf.mxu2 }
 0x1c5   : > { %v704_v11 = vmax.f32 %v656_v8, 0.0  ;;  %v816_v12 = vadd.f32 %v1339_v54, %v815_v9 }
 0x1c7   : > { %891 = vst [vmem:[%s1346_s10 + $0x18] sm:$0xff] %v816_v12  ;;  %v725_v13 = vpack.c.bf16 %v704_v11, %v703_v10 }
 0x1c9   : > { %857 = vmatmul.bf16.gmra.mxu2 %v725_v13 }
 0x1ca   : > { %v658_v14 = vpop.f32.mrf.mxu1 }
 0x1cb   : > { %v659_v17 = vadd.f32 %v1302_v4, %v658_v14 }
 0x1cc   : > { %v818_v15 = vpop.f32.mrf.mxu2 }
 0x1cd   : > { %v819_v16 = vadd.f32 %v1339_v54, %v818_v15  ;;  %v705_v21 = vmax.f32 %v659_v17, 0.0 }
 0x1cf   : > { %892 = vst [vmem:[%s1346_s10 + $0x20] sm:$0xff] %v819_v16 }
 0x1d2   : > { %v660_v18 = vpop.f32.mrf.mxu1 }
 0x1d3   : > { %v661_v19 = vadd.f32 %v1302_v4, %v660_v18 }
 0x1d4   : > { %v820_v20 = vpop.f32.mrf.mxu2 }
 0x1d5   : > { %v706_v22 = vmax.f32 %v661_v19, 0.0  ;;  %v821_v23 = vadd.f32 %v1339_v54, %v820_v20 }
 0x1d7   : > { %893 = vst [vmem:[%s1346_s10 + $0x28] sm:$0xff] %v821_v23  ;;  %v726_v24 = vpack.c.bf16 %v706_v22, %v705_v21 }
 0x1d9   : > { %862 = vmatmul.bf16.gmra.mxu2 %v726_v24 }
 0x1dc   : > { %v823_v25 = vpop.f32.mrf.mxu2 }
 0x1dd   : > { %v824_v26 = vadd.f32 %v1339_v54, %v823_v25 }
 0x1df   : > { %894 = vst [vmem:[%s1346_s10 + $0x30] sm:$0xff] %v824_v26 }
 0x1e0   : > { %v663_v27 = vpop.f32.mrf.mxu3 }
 0x1e1   : > { %v664_v30 = vadd.f32 %v1302_v4, %v663_v27 }
 0x1e3   : > { %v707_v33 = vmax.f32 %v664_v30, 0.0 }
 0x1e4   : > { %v825_v28 = vpop.f32.mrf.mxu2 }
 0x1e5   : > { %v826_v29 = vadd.f32 %v1339_v54, %v825_v28 }
 0x1e7   : > { %895 = vst [vmem:[%s1346_s10 + $0x38] sm:$0xff] %v826_v29 }
 0x1e8   : > { %v665_v31 = vpop.f32.mrf.mxu3 }
 0x1e9   : > { %v666_v32 = vadd.f32 %v1302_v4, %v665_v31 }
 0x1eb   : > { %v708_v34 = vmax.f32 %v666_v32, 0.0 }
 0x1ec   : > { %v828_v35 = vpop.f32.mrf.mxu2 }
 0x1ed   : > { %v727_v36 = vpack.c.bf16 %v708_v34, %v707_v33  ;;  %v829_v37 = vadd.f32 %v1339_v54, %v828_v35 }
 0x1ef   : > { %896 = vst [vmem:[%s1346_s10 + $0x40] sm:$0xff] %v829_v37  ;;  %867 = vmatmul.bf16.vlgmr.msra.gmra.mxu3 %v727_v36 }
 0x1f0   : > { %v668_v39 = vpop.f32.mrf.mxu3 }
 0x1f1   : > { %v669_v42 = vadd.f32 %v1302_v4, %v668_v39 }
 0x1f3   : > { %v709_v45 = vmax.f32 %v669_v42, 0.0 }
 0x1f4   : > { %v830_v40 = vpop.f32.mrf.mxu2 }
 0x1f5   : > { %v831_v41 = vadd.f32 %v1339_v54, %v830_v40 }
 0x1f7   : > { %897 = vst [vmem:[%s1346_s10 + $0x48] sm:$0xff] %v831_v41 }
 0x1f8   : > { %v670_v43 = vpop.f32.mrf.mxu3 }
 0x1f9   : > { %v671_v44 = vadd.f32 %v1302_v4, %v670_v43 }
 0x1fb   : > { %v710_v46 = vmax.f32 %v671_v44, 0.0 }
 0x1fc   : > { %v833_v38 = vpop.f32.mrf.mxu2 }
 0x1fd   : > { %v834_v47 = vadd.f32 %v1339_v54, %v833_v38  ;;  %v728_v48 = vpack.c.bf16 %v710_v46, %v709_v45 }
 0x1ff   : > { %898 = vst [vmem:[%s1346_s10 + $0x50] sm:$0xff] %v834_v47  ;;  %872 = vmatmul.bf16.gmra.mxu3 %v728_v48 }
 0x200   : > { %v673_v49 = vpop.f32.mrf.mxu3 }
 0x201   : > { %v674_v52 = vadd.f32 %v1302_v4, %v673_v49 }
 0x203   : > { %v711_v56 = vmax.f32 %v674_v52, 0.0 }
 0x204   : > { %v835_v50 = vpop.f32.mrf.mxu2 }
 0x205   : > { %v836_v51 = vadd.f32 %v1339_v54, %v835_v50 }
 0x207   : > { %899 = vst [vmem:[%s1346_s10 + $0x58] sm:$0xff] %v836_v51 }
 0x208   : > { %v675_v53 = vpop.f32.mrf.mxu3 }
 0x209   : > { %v676_v55 = vadd.f32 %v1302_v4, %v675_v53 }
 0x20b   : > { %v712_v57 = vmax.f32 %v676_v55, 0.0 }
 0x20c   : > { %v838_v58 = vpop.f32.mrf.mxu2 }
 0x20d   : > { %v839_v59 = vadd.f32 %v1339_v54, %v838_v58  ;;  %v729_v60 = vpack.c.bf16 %v712_v57, %v711_v56 }
 0x20f   : > { %900 = vst [vmem:[%s1346_s10 + $0x60] sm:$0xff] %v839_v59  ;;  %877 = vmatmul.bf16.gmra.mxu3 %v729_v60 }
 0x210   : > { %v678_v61 = vpop.f32.mrf.mxu3 }
 0x211   : > { %v679_v0 = vadd.f32 %v1302_v4, %v678_v61 }
 0x213   : > { %v713_v3 = vmax.f32 %v679_v0, 0.0 }
 0x214   : > { %v840_v62 = vpop.f32.mrf.mxu2 }
 0x215   : > { %v841_v63 = vadd.f32 %v1339_v54, %v840_v62 }
 0x217   : > { %901 = vst [vmem:[%s1346_s10 + $0x68] sm:$0xff] %v841_v63 }
 0x218   : > { %v680_v1 = vpop.f32.mrf.mxu3 }
 0x219   : > { %v681_v2 = vadd.f32 %v1302_v4, %v680_v1 }
 0x21b   : > { %v714_v5 = vmax.f32 %v681_v2, 0.0 }
 0x21c   : > { %v843_v6 = vpop.f32.mrf.mxu2 }
 0x21d   : > { %v844_v7 = vadd.f32 %v1339_v54, %v843_v6  ;;  %v730_v8 = vpack.c.bf16 %v714_v5, %v713_v3 }
 0x21f   : > { %902 = vst [vmem:[%s1346_s10 + $0x70] sm:$0xff] %v844_v7  ;;  %882 = vmatmul.bf16.gmra.mxu3 %v730_v8 }
 0x224   : > { %v845_v9 = vpop.f32.mrf.mxu2 }
 0x225   : > { %v846_v10 = vadd.f32 %v1339_v54, %v845_v9 }
 0x227   : > { %903 = vst [vmem:[%s1346_s10 + $0x78] sm:$0xff] %v846_v10 }
 0x22c   : > { %v848_v11 = vpop.f32.mrf.mxu2 }
 0x22d   : > { %v849_v12 = vadd.f32 %v1339_v54, %v848_v11 }
 0x22f   : > { %904 = vst [vmem:[%s1346_s10 + $0x80] sm:$0xff] %v849_v12 }
 0x234   : > { %v850_v4 = vpop.f32.mrf.mxu2 }
 0x235   : > { %v851_v13 = vadd.f32 %v1339_v54, %v850_v4 }
 0x237   : > { %905 = vst [vmem:[%s1346_s10 + $0x88] sm:$0xff] %v851_v13 }
 0x23c   : > { %v853_v14 = vpop.f32.mrf.mxu2 }
 0x23d   : > { %v854_v15 = vadd.f32 %v1339_v54, %v853_v14 }
 0x23f   : > { %906 = vst [vmem:[%s1346_s10 + $0x90] sm:$0xff] %v854_v15 }
 0x244   : > { %v855_v16 = vpop.f32.mrf.mxu2 }
 0x245   : > { %v856_v17 = vadd.f32 %v1339_v54, %v855_v16 }
 0x247   : > { %907 = vst [vmem:[%s1346_s10 + $0x98] sm:$0xff] %v856_v17 }
 0x24c   : > { %v858_v18 = vpop.f32.mrf.mxu2 }
 0x24d   : > { %v859_v19 = vadd.f32 %v1339_v54, %v858_v18 }
 0x24f   : > { %908 = vst [vmem:[%s1346_s10 + $0xa0] sm:$0xff] %v859_v19 }
 0x254   : > { %v860_v20 = vpop.f32.mrf.mxu2 }
 0x255   : > { %v861_v21 = vadd.f32 %v1339_v54, %v860_v20 }
 0x257   : > { %909 = vst [vmem:[%s1346_s10 + $0xa8] sm:$0xff] %v861_v21 }
 0x25c   : > { %v863_v22 = vpop.f32.mrf.mxu2 }
 0x25d   : > { %v864_v23 = vadd.f32 %v1339_v54, %v863_v22 }
 0x25f   : > { %910 = vst [vmem:[%s1346_s10 + $0xb0] sm:$0xff] %v864_v23 }
 0x264   : > { %v865_v24 = vpop.f32.mrf.mxu2 }
 0x265   : > { %v866_v25 = vadd.f32 %v1339_v54, %v865_v24 }
 0x267   : > { %911 = vst [vmem:[%s1346_s10 + $0xb8] sm:$0xff] %v866_v25 }
 0x272   : > { %v868_v26 = vpop.f32.mrf.mxu3 }
 0x273   : > { %v869_v27 = vadd.f32 %v1339_v54, %v868_v26 }
 0x275   : > { %912 = vst [vmem:[%s1346_s10 + $0xc0] sm:$0xff] %v869_v27 }
 0x27a   : > { %v870_v28 = vpop.f32.mrf.mxu3 }
 0x27b   : > { %v871_v29 = vadd.f32 %v1339_v54, %v870_v28 }
 0x27d   : > { %913 = vst [vmem:[%s1346_s10 + $0xc8] sm:$0xff] %v871_v29 }
 0x282   : > { %v873_v30 = vpop.f32.mrf.mxu3 }
 0x283   : > { %v874_v31 = vadd.f32 %v1339_v54, %v873_v30 }
 0x285   : > { %914 = vst [vmem:[%s1346_s10 + $0xd0] sm:$0xff] %v874_v31 }
 0x28a   : > { %v875_v32 = vpop.f32.mrf.mxu3 }
 0x28b   : > { %v876_v33 = vadd.f32 %v1339_v54, %v875_v32 }
 0x28d   : > { %915 = vst [vmem:[%s1346_s10 + $0xd8] sm:$0xff] %v876_v33 }
 0x292   : > { %v878_v34 = vpop.f32.mrf.mxu3 }
 0x293   : > { %v879_v35 = vadd.f32 %v1339_v54, %v878_v34 }
 0x295   : > { %916 = vst [vmem:[%s1346_s10 + $0xe0] sm:$0xff] %v879_v35 }
 0x29a   : > { %v880_v36 = vpop.f32.mrf.mxu3 }
 0x29b   : > { %v881_v37 = vadd.f32 %v1339_v54, %v880_v36 }
 0x29d   : > { %917 = vst [vmem:[%s1346_s10 + $0xe8] sm:$0xff] %v881_v37 }
 0x2a2   : > { %v883_v39 = vpop.f32.mrf.mxu3 }
 0x2a3   : > { %v884_v40 = vadd.f32 %v1339_v54, %v883_v39 }
 0x2a5   : > { %918 = vst [vmem:[%s1346_s10 + $0xf0] sm:$0xff] %v884_v40 }
 0x2aa   : > { %v885_v41 = vpop.f32.mrf.mxu3 }
 0x2ab   : > { %v886_v42 = vadd.f32 %v1339_v54, %v885_v41 }
 0x2ad   : > { %919 = vst [vmem:[%s1346_s10 + $0xf8] sm:$0xff] %v886_v42 }
 0x2ae PF: > { %s17_s24 = sadd.s32 1, %s1117_s24  }
 0x2af   : > { %p14_p4 = scmp.ge.s32.totalorder %s17_s24, 4  }
 0x2b1   :  { %16 = sbr.rel (!%p14_p4) target bundleno = 1 (0x1), region = 78 }

</bundles_post_ra>
